<compile_context>
chip_gen: v7x
topology: tpu7x:2x2x1
jax: 0.10.0
libtpu: 0.0.40
codegen_flags: <defaults>
</compile_context>

<pallas_src>
import functools

import jax
import jax.numpy as jnp
from jax.experimental import pallas as pl
from jax.experimental.pallas import tpu as pltpu

_LANE = 128
_ENC_BUF_BUDGET = 5 * 1024 * 1024      # bytes per enc VMEM buffer (double-buffered -> 2x)
_BATCH_TILE_TARGET = 2 * 1024 * 1024   # grow batch tile until per-step bytes reach this


def _pick_tiles(B, S, E, itemsize):
    """Pick (tb, ts): seq tile (lane-dense multiple of 128, or full S when small)
    and a batch tile that amortizes per-grid-step overhead when seq tiles are tiny."""
    if S < _LANE:
        ts = S                      # block dim == full array dim satisfies (8,128) rule
    else:
        ts = _LANE
        for cand in (2048, 1024, 512, 256):
            if cand <= S and cand * E * itemsize <= _ENC_BUF_BUDGET:
                ts = cand
                break
    tile_bytes = ts * E * itemsize
    tb = 1
    if B > 1 and tile_bytes < _BATCH_TILE_TARGET:
        tb = min(B, max(1, _BATCH_TILE_TARGET // max(tile_bytes, 1)))
    # v7x megacore: keep >= 2 grid cells so both TensorCores get work.
    if pl.cdiv(S, ts) == 1 and B > 1:
        tb = min(tb, pl.cdiv(B, 2))
    return tb, ts


def _alignment_kernel(enc_ref, v_ref, t_ref, out_ref, *, use_mxu):
    # enc_ref : (tb, ts, E)  streamed encoder tile
    # v_ref   : (tb, 1, E)   per-batch dec @ W (precomputed in wrapper)
    # t_ref   : (tb, 1, 1)   per-batch dec . bias (f32, precomputed in wrapper)
    # out_ref : (tb, 1, ts)  lane-dense output tile
    enc = enc_ref[...]
    v = v_ref[...]
    t = t_ref[...]
    if use_mxu:
        # E is a multiple of 128: batched (1,E)x(ts,E)^T contraction on the MXU,
        # result lands directly as lane-dense (tb, 1, ts).
        scores = jax.lax.dot_general(
            v, enc,
            dimension_numbers=(((2,), (2,)), ((0,), (0,))),
            preferred_element_type=jnp.float32)                      # (tb, 1, ts)
    else:
        # Small / ragged E: VPU multiply + reduce over E (huge VALU/XLU slack,
        # avoids an underfilled MXU push/pop per step; no padding of E).
        prod = enc.astype(jnp.float32) * v.astype(jnp.float32)       # (tb, ts, E)
        scores = jnp.sum(prod, axis=-1)[:, None, :]                  # (tb, 1, ts)
    out_ref[...] = (scores + t).astype(out_ref.dtype)


def general_alignment(encoder_outputs, decoder_hidden_state, weight, bias):
    """encoder_outputs: (B, S, E); decoder_hidden_state: (B, C);
    weight: (C, E) (nn.Linear layout); bias: (C,).  Returns (B, S)."""
    B, S, E = encoder_outputs.shape
    dtype = encoder_outputs.dtype
    itemsize = dtype.itemsize

    # Per-batch precompute hoisted out of the kernel (tiny ops, done once in XLA):
    #   v[b] = dec[b] @ W   (weight used in native (C,E) layout -> no transpose)
    #   t[b] = dec[b] . bias
    v = jnp.dot(decoder_hidden_state, weight,
                preferred_element_type=jnp.float32)                  # (B, E)
    t = jnp.sum(decoder_hidden_state.astype(jnp.float32)
                * bias.astype(jnp.float32)[None, :], axis=-1)        # (B,)
    v3 = v.astype(dtype).reshape(B, 1, E)
    t3 = t.reshape(B, 1, 1)                                          # stays f32

    tb, ts = _pick_tiles(B, S, E, itemsize)
    grid = (pl.cdiv(B, tb), pl.cdiv(S, ts))

    # Explicit VMEM budget: double-buffered enc stream + output tiles + residents.
    enc_buf = tb * ts * E * itemsize
    out_buf = tb * ts * itemsize
    needed = 2 * (enc_buf + out_buf + tb * E * itemsize + tb * 4)
    vmem_limit = int(min(max(needed + (4 << 20), 16 << 20), 32 << 20))

    use_mxu = (E % _LANE == 0)
    kernel = functools.partial(_alignment_kernel, use_mxu=use_mxu)

    out3 = pl.pallas_call(
        kernel,
        out_shape=jax.ShapeDtypeStruct((B, 1, S), dtype),
        grid=grid,
        in_specs=[
            pl.BlockSpec((tb, ts, E), lambda bi, j: (bi, j, 0)),   # enc (streamed)
            pl.BlockSpec((tb, 1, E), lambda bi, j: (bi, 0, 0)),    # v  (per-batch)
            pl.BlockSpec((tb, 1, 1), lambda bi, j: (bi, 0, 0)),    # t  (per-batch)
        ],
        out_specs=pl.BlockSpec((tb, 1, ts), lambda bi, j: (bi, 0, j)),
        compiler_params=pltpu.CompilerParams(
            dimension_semantics=("parallel", "parallel"),
            vmem_limit_bytes=vmem_limit),
    )(encoder_outputs, v3, t3)

    return out3.reshape(B, S)


def general_alignment_ref(encoder_outputs, decoder_hidden_state, weight, bias):
    # Pure-JAX reference mirroring the PyTorch two-step forward.
    scores = jnp.einsum("bse,ce->bsc", encoder_outputs, weight) + bias
    return jnp.einsum("bsc,bc->bs", scores, decoder_hidden_state)


if __name__ == "__main__":
    B, S, E, C = 2, 8, 32, 32   # batch, seq_len, encoder_output_size, context_vector_size

    key = jax.random.PRNGKey(0)
    k_enc, k_dec, k_w, k_b = jax.random.split(key, 4)

    encoder_outputs = jax.random.normal(k_enc, (B, S, E), dtype=jnp.float32)
    decoder_hidden = jax.random.normal(k_dec, (B, C), dtype=jnp.float32)
    # Deterministic "nn.Linear(E, C)" parameters: weight (C, E), bias (C,)
    bound = 1.0 / (E ** 0.5)
    weight = jax.random.uniform(k_w, (C, E), minval=-bound, maxval=bound, dtype=jnp.float32)
    bias = jax.random.uniform(k_b, (C,), minval=-bound, maxval=bound, dtype=jnp.float32)

    out = general_alignment(encoder_outputs, decoder_hidden, weight, bias)
    out = jax.block_until_ready(out)

    ref = general_alignment_ref(encoder_outputs, decoder_hidden, weight, bias)
    assert out.shape == (B, S), out.shape
    assert jnp.allclose(out, ref, atol=1e-4, rtol=1e-4), "mismatch vs reference"

    print("KERNEL_OK")
</pallas_src>

<mosaic_0001>
module attributes {stable_mosaic.version = 11 : i64} {
  func.func @_alignment_kernel(%arg0: i32, %arg1: i32, %arg2: memref<1x8x32xf32, #tpu.memory_space<vmem>>, %arg3: memref<1x1x32xf32, #tpu.memory_space<vmem>>, %arg4: memref<1x1x1xf32, #tpu.memory_space<vmem>>, %arg5: memref<1x1x8xf32, #tpu.memory_space<vmem>>) attributes {dimension_semantics = [#tpu.dimension_semantics<parallel>, #tpu.dimension_semantics<parallel>], iteration_bounds = array<i64: 2, 1>, scalar_prefetch = 0 : i64, scratch_operands = 0 : i64, tpu.core_type = #tpu.core_type<tc>, window_params = [{transform_indices = @transform_0, window_bounds = array<i64: 1, 8, 32>}, {transform_indices = @transform_1, window_bounds = array<i64: 1, 1, 32>}, {transform_indices = @transform_2, window_bounds = array<i64: 1, 1, 1>}, {transform_indices = @transform_3, window_bounds = array<i64: 1, 1, 8>}]} {
    %c0 = arith.constant 0 : index
    %c0_0 = arith.constant 0 : index
    %c0_1 = arith.constant 0 : index
    %0 = vector.load %arg2[%c0, %c0_0, %c0_1] : memref<1x8x32xf32, #tpu.memory_space<vmem>>, vector<1x8x32xf32>
    %c0_2 = arith.constant 0 : index
    %c0_3 = arith.constant 0 : index
    %c0_4 = arith.constant 0 : index
    %1 = vector.load %arg3[%c0_2, %c0_3, %c0_4] : memref<1x1x32xf32, #tpu.memory_space<vmem>>, vector<1x1x32xf32>
    %c0_5 = arith.constant 0 : index
    %c0_6 = arith.constant 0 : index
    %c0_7 = arith.constant 0 : index
    %2 = vector.load %arg4[%c0_5, %c0_6, %c0_7] : memref<1x1x1xf32, #tpu.memory_space<vmem>>, vector<1x1x1xf32>
    %3 = vector.broadcast %1 : vector<1x1x32xf32> to vector<1x8x32xf32>
    %4 = arith.mulf %0, %3 : vector<1x8x32xf32>
    %cst = arith.constant dense<0.000000e+00> : vector<1x8xf32>
    %5 = vector.multi_reduction <add>, %4, %cst [2] : vector<1x8x32xf32> to vector<1x8xf32>
    %6 = vector.shape_cast %5 : vector<1x8xf32> to vector<1x1x8xf32>
    %7 = vector.broadcast %2 : vector<1x1x1xf32> to vector<1x1x8xf32>
    %8 = arith.addf %6, %7 : vector<1x1x8xf32>
    %c0_8 = arith.constant 0 : index
    %c0_9 = arith.constant 0 : index
    %c0_10 = arith.constant 0 : index
    %9 = vector.load %arg5[%c0_8, %c0_9, %c0_10] : memref<1x1x8xf32, #tpu.memory_space<vmem>>, vector<1x1x8xf32>
    tpu.vector_store %arg5[%c0_8, %c0_9, %c0_10], %8 {strides = array<i32>} : memref<1x1x8xf32, #tpu.memory_space<vmem>>, vector<1x1x8xf32>,
    return
  }
  func.func @transform_0(%arg0: i32, %arg1: i32) -> (i32, i32, i32) {
    %c0_i32 = arith.constant 0 : i32
    %c0_i32_0 = arith.constant 0 : i32
    return %arg0, %arg1, %c0_i32 : i32, i32, i32
  }
  func.func @transform_1(%arg0: i32, %arg1: i32) -> (i32, i32, i32) {
    %c0_i32 = arith.constant 0 : i32
    %c0_i32_0 = arith.constant 0 : i32
    %c0_i32_1 = arith.constant 0 : i32
    return %arg0, %c0_i32, %c0_i32_0 : i32, i32, i32
  }
  func.func @transform_2(%arg0: i32, %arg1: i32) -> (i32, i32, i32) {
    %c0_i32 = arith.constant 0 : i32
    %c0_i32_0 = arith.constant 0 : i32
    %c0_i32_1 = arith.constant 0 : i32
    return %arg0, %c0_i32, %c0_i32_0 : i32, i32, i32
  }
  func.func @transform_3(%arg0: i32, %arg1: i32) -> (i32, i32, i32) {
    %c0_i32 = arith.constant 0 : i32
    %c0_i32_0 = arith.constant 0 : i32
    return %arg0, %c0_i32, %arg1 : i32, i32, i32
  }
}

</mosaic_0001>

<bundles_post_ra>
// kernel: tpu_custom_call.1
= control target key start
LH: loop header
LB: loop body
LE: loop exit
PB: predicated region body
PF: predicated region fallthrough
CT: control target
= control target key end

     0   :  { %8 = vsyncpa [#allocation3], 0  ;;  %s766_s0 = inlined_call_operand.hbm [shape: f32[2,8,32], index: 0, kind: input, shape index: {}]   ;;  %s767_s1 = inlined_call_operand.vmem [shape: f32[2,1,32], index: 1, kind: input, shape index: {}]   ;;  %s768_s2 = inlined_call_operand.vmem [shape: f32[2,1,1], index: 2, kind: input, shape index: {}]   ;;  %s769_s3 = inlined_call_operand.hbm [shape: f32[2,1,8], index: 3, kind: output, shape index: {}]  }
   0x1   :  { %10 = vsyncpa [#allocation3 + $0x1], 0 }
   0x2   :  { %11 = vsyncpa [#allocation4], 0 }
   0x3   :  { %13 = vsyncpa [#allocation4 + $0x1], 0  ;;  %s585_s12 = smov 0   ;;  %s587_s13 = smov 0  }
   0x4   :  { %s589_s14 = smov 0   ;;  %s591_s15 = smov 0  }
   0x5   :  { %s593_s16 = smov 0   ;;  %s595_s17 = smov 0  }
   0x6 LB: > { %s372_s18 = sadd.s32 4294967295, %s560_s17   ;;  %s373_s19 = sadd.s32 4294967294, %s560_s17   ;;  %s560_s17 = sphi %s595_s17, %s19_s17   ;;  %s556_s16 = sphi %s593_s16, %s785_s16   ;;  %s552_s15 = sphi %s591_s15, %s784_s15   ;;  %s548_s14 = sphi %s589_s14, %s783_s14   ;;  %s544_s13 = sphi %s587_s13, %s782_s13   ;;  %s540_s12 = sphi %s585_s12, %s781_s12  }
   0x7   : > { %s31_s20 = sadd.s32 1, %s556_s16  ;;  %s40_s21 = sadd.s32 1, %s548_s14 }
   0x8   : > { %p33_p0 = scmp.ge.s32.totalorder %s31_s20, 2  ;;  %p47_p1 = scmp.ne.s32.totalorder %s548_s14, %s544_s13 }
   0x9   : > { %p48_p2 = scmp.eq.s32.totalorder %s560_s17, 0  ;;  %p53_p3 = scmp.ne.s32.totalorder %s544_s13, %s540_s12 }
   0xa   : > { %s787_s20 = smov (%p33_p0, %s31_s20), 0  ;;  %p54_p5 = scmp.eq.s32.totalorder %s372_s18, 0 }
   0xb   : > { %p626_p4 = por %p48_p2, %p47_p1  ;;  %s35_s23 = ssub.s32 %s556_s16, %s787_s20 }
   0xc   : > { %p131_p6 = scmp.eq.s32.totalorder %s372_s18, 1  ;;  %p38_p7 = scmp.eq.s32.totalorder %s35_s23, 0 }
   0xd   : > { %p632_p8 = por %p54_p5, %p53_p3  ;;  %p137_p10 = scmp.eq.s32.totalorder %s373_s19, 1 }
   0xe   : > { %p636_p9 = por %p131_p6, %p47_p1  ;;  %p396_p13 = scmp.lt.s32.totalorder %s560_s17, 2 }
   0xf   : > { %s641_s26 = scalar_select %p38_p7, %s548_s14, %s40_s21  }
  0x10   : > { %s773_s25 = scalar_select %p636_p9, 1, 0 }
  0x11   : > { %p643_p11 = por %p137_p10, %p53_p3  ;;  %s157_s28 = sand.u32 1, %s548_s14  }
  0x12   : > { %s376_s29 = sshll.u32 %s157_s28, 3  ;;  %s377_s30 = sshll.u32 %s556_s16, 7 }
  0x13   : > { %s774_s27 = scalar_select %p643_p11, 1, 0 }
  0x14   : > { %s654_s6 = scalar_lea.hbm %s766_s0, %s377_s30  ;;  %s161_s7 = scalar_lea.vmem [#allocation2], %s376_s29 }
  0x15   : > { %s169_s8 = sshll.u32 %s161_s7, 4  ;;  %p660_p0 = pnand %p396_p13, %p626_p4  ;;  %s656_s8 = int_to_ptr.vmem [resolvable:$true] %s169_s8 }
  0x16   : > { %s158_s10 = scalar_lea.sflag [#allocation3], %s157_s28  ;;  %s448_s11 = scalar_lea.hbm %s654_s6, 128 }
  0x17   : > { %p449_p3 = scmp.ne.s32.totalorder %s654_s6, %s448_s11  ;;  %p450_p5 = pneg %p660_p0 }
  0x18   : > { %s453_s21 = scalar_lea.hbm %s766_s0, 256  ;;  %p454_p4 = scmp.lt.u32.totalorder %s654_s6, %s766_s0 }
  0x19   : > { %p451_p6 = pnand %p450_p5, %p449_p3  ;;  %p455_p10 = scmp.lt.u32.totalorder %s453_s21, %s448_s11 }
  0x1a   : > { %p457_p12 = scmp.lt.u32.totalorder %s448_s11, %s654_s6 }
  0x1b   : > { %p452_p7 = pneg %p451_p6  ;;  %p456_p13 = por %p455_p10, %p454_p4 }
  0x1d   : > { %p458_p1 = por %p457_p12, %p456_p13 }
  0x1f   : > { %p459_p2 = pnand %p458_p1, %p452_p7 }
  0x21   : > { %462 = shalt.err (!%p459_p2)
}
  0x22   : > { %s463_s28 = scalar_lea.vmem %s656_s8, 128  ;;  %s562_s29 = smov [#allocation2]  }
  0x23   : > { %p464_p3 = scmp.ne.s32.totalorder %s656_s8, %s463_s28  ;;  %s468_s30 = sshll.u32 %s562_s29, 4  ;;  %s469_s30 = int_to_ptr.vmem [resolvable:$false] %s468_s30 }
  0x24   : > { %s470_s4 = scalar_lea.vmem %s469_s30, 256  ;;  %p471_p9 = scmp.lt.s32.totalorder %s656_s8, %s469_s30 }
  0x25   : > { %p466_p6 = pnand %p464_p3, %p450_p5  ;;  %p472_p4 = scmp.lt.s32.totalorder %s470_s4, %s463_s28 }
  0x27   : > { %p467_p11 = pneg %p466_p6  ;;  %p473_p10 = por %p472_p4, %p471_p9 }
  0x29   : > { %p474_p12 = pnand %p473_p10, %p467_p11 }
  0x2b   : > { %477 = shalt.err (!%p474_p12)
}
  0x2c   : > { %391 = dma.hbm_to_vmem [thread:$0]  (!%p660_p0), %s654_s6, 128, %s656_s8, %s158_s10  }
  0x2d   : > { %p776_p1 = scmp.lt.s32.totalorder %s560_s17, 3  ;;  %p777_p2 = scmp.ge.s32.totalorder %s560_s17, 1 }
  0x2f   : > { %p187_p5 = pnand %p777_p2, %p776_p1 }
  0x30   : > { %s696_s5 = sand.u32 (!%p187_p5), 1, %s544_s13  }
  0x31   : > { %190 = sbr.rel (%p187_p5) target bundleno = 236 (0xec), region = 32  ;;  %s379_s7 = sshll.u32 (!%p187_p5), %s696_s5, 3 }
  0x32   : > { %s193_s11 = scalar_lea.sflag (!%p187_p5), [#allocation3], %s696_s5  ;;  %s196_s18 = scalar_lea.vmem (!%p187_p5), [#allocation2], %s379_s7 }
  0x38   : > { %531 = dma.done.wait (%p632_p8), %s193_s11, 128  }
  0x39   : > { %533 = vsyncadd (%p632_p8), %s193_s11, 4294967168  ;;  %p224_p9 = scmp.lt.s32.totalorder %s552_s15, 1  ;;  %v563_v0 = vmov 0   ;;  %v230_v1 = vld [vmem:[%s196_s18] sm:$0xff]  ;;  %vm240_vm0 = vcmask 261120   ;;  %v249_v6 = vlaneseq  ;;  %s381_s22 = sshll.u32 %s552_s15, 4 }
  0x3a   : > { %447 = vset.pattern.permute.xlu0 %v563_v0  ;;  %s223_s23 = scalar_lea.vmem [#allocation5], %s696_s5  ;;  %vm262_vm1 = vcmask 57344   ;;  %s717_s4 = scalar_lea.hbm %s769_s3, %s381_s22 }
  0x3b   : > { %s225_s6 = scalar_select %p224_p9, %s552_s15, 1  ;;  %v250_v7 = vshrl.u32 %v249_v6, 7  ;;  %v256_v10 = vand.u32 127, %v249_v6 }
  0x3c   : > { %s278_s28 = sshll.u32 %s223_s23, 4  ;;  %s265_s7 = scalar_lea.sflag [#allocation4], %s696_s5  ;;  %s719_s28 = int_to_ptr.vmem [resolvable:$true] %s278_s28 }
  0x3d   : > { %s226_s10 = scalar_lea.vmem %s767_s1, %s225_s6  ;;  %s229_s21 = scalar_lea.vmem %s768_s2, %s225_s6  ;;  %v251_v9 = vsub.s32 0, %v250_v7  ;;  %v259_v12 = vsub.s32 %v256_v10, %v250_v7 }
  0x3e   : > { %v380_v2 = vld [vmem:[%s226_s10] ss:$0 sm:$0xff]  ;;  %s478_s11 = scalar_lea.vmem %s719_s28, 16  ;;  %p778_p11 = scmp.ne.s32.totalorder %s773_s25, 0 }
  0x3f   : > { %v239_v3 = vmul.f32 %v380_v2, %v230_v1  ;;  %v232_v5 = vld [vmem:[%s229_s21] sm:$0x1]  ;;  %p479_p8 = scmp.ne.s32.totalorder %s719_s28, %s478_s11  ;;  %s564_s15 = smov [#allocation5]  }
  0x40   : > { %s482_s18 = sshll.u32 %s564_s15, 4  ;;  %s483_s18 = int_to_ptr.vmem [resolvable:$false] %s482_s18 }
  0x41   : > { %v241_v4 = vsel %vm240_vm0, %v239_v3, 0.0  ;;  %p480_p0 = pnand %p479_p8, %p778_p11  ;;  %s484_s6 = scalar_lea.vmem %s483_s18, 32 }
  0x42   : > { %242 = vadd.xlane.f32.xlu0 %v241_v4  ;;  %p485_p13 = scmp.lt.s32.totalorder %s719_s28, %s483_s18  ;;  %p486_p3 = scmp.lt.s32.totalorder %s484_s6, %s478_s11 }
  0x43   : > { %p481_p7 = pneg %p480_p0 }
  0x44   : > { %p487_p6 = por %p486_p3, %p485_p13 }
  0x46   : > { %p488_p4 = pnand %p487_p6, %p481_p7 }
  0x58   : > { %246 = vperm.xlu0 %447, %v232_v5  }
  0xcf   : > { %v243_v8 = vpop.xlane.xlu0 %242 }
  0xd7   : > { %v247_v11 = vpop.permute.xlu0 %246 }
  0xd8   : > { %v252_v13 = vrot.slane %v247_v11, %v251_v9 }
  0xda   : > { %v253_v14 = vadd.f32 %v252_v13, %v243_v8 }
  0xdc   : > { %v260_v15 = vrot.slane %v253_v14, %v259_v12 }
  0xde   : > { %263 = vst.msk [vmem:[%s223_s23] sm:$0x1] %vm262_vm1, %v260_v15 }
  0xdf   : > { %491 = shalt.err (!%p488_p4)
}
  0xe0   : > { %s492_s5 = scalar_lea.hbm %s717_s4, 16  ;;  %s496_s10 = scalar_lea.hbm %s769_s3, 32 }
  0xe1   : > { %p493_p10 = scmp.ne.s32.totalorder %s717_s4, %s492_s5  ;;  %p497_p2 = scmp.lt.u32.totalorder %s717_s4, %s769_s3 }
  0xe2   : > { %p498_p5 = scmp.lt.u32.totalorder %s496_s10, %s492_s5  ;;  %p500_p8 = scmp.lt.u32.totalorder %s492_s5, %s717_s4 }
  0xe3   : > { %p494_p12 = pnand %p493_p10, %p778_p11 }
  0xe4   : > { %p499_p9 = por %p498_p5, %p497_p2 }
  0xe5   : > { %p495_p1 = pneg %p494_p12 }
  0xe6   : > { %p501_p0 = por %p500_p8, %p499_p9 }
  0xe8   : > { %p502_p7 = pnand %p501_p0, %p495_p1 }
  0xea   : > { %505 = shalt.err (!%p502_p7)
}
  0xeb   : > { %386 = dma.vmem_to_hbm [thread:$0]  (%p778_p11), %s719_s28, 16, %s717_s4, %s265_s7  }
  0xec PF: > { %s290_s21 = sand.u32 1, %s540_s12   ;;  %p779_p13 = scmp.ne.s32.totalorder %s774_s27, 0 }
  0xed   : > { %p780_p3 = scmp.ge.s32.totalorder %s560_s17, 2  ;;  %s291_s22 = scalar_lea.sflag [#allocation4], %s290_s21 }
  0xef   : > { %p393_p6 = pnand %p780_p3, %p779_p13 }
  0xf1   : > { %535 = dma.done.wait (!%p393_p6), %s291_s22, 16  }
  0xf2   : > { %537 = vsyncadd (!%p393_p6), %s291_s22, 4294967280  ;;  %s19_s17 = sadd.s32 1, %s560_s17   ;;  %s781_s12 = smov %s544_s13 }
  0xf3   : > { %p16_p4 = scmp.ge.s32.totalorder %s19_s17, 4   ;;  %s782_s13 = smov %s548_s14 }
  0xf4   : > { %s783_s14 = smov %s641_s26  ;;  %s784_s15 = smov %s556_s16 }
  0xf5   : > { %s785_s16 = smov %s787_s20  ;;  %18 = sbr.rel (!%p16_p4) target bundleno = 6 (0x6), region = 83 }
  0xfc   :  { %295 = vsyncpa [#allocation3], 1 }
  0xfd   :  { %297 = vsyncpa [#allocation3 + $0x1], 1 }
  0xfe   :  { %298 = vsyncpa [#allocation4], 1 }
  0xff   :  { %300 = vsyncpa [#allocation4 + $0x1], 1 }

</bundles_post_ra>
